<compile_context>
chip_gen: v7x
topology: tpu7x:2x2x1
jax: 0.10.0
libtpu: 0.0.40
codegen_flags: <defaults>
</compile_context>

<pallas_src>
from functools import partial

import jax
import jax.numpy as jnp
from jax.experimental import pallas as pl
from jax.experimental.pallas import tpu as pltpu


def _add_one_kernel(p_ref, o_ref):
    # Scalar add on the SMEM / scalar-ALU path. p_ref and o_ref alias the
    # same buffer; the read happens before the write, so this is safe.
    o_ref[0, 0] = p_ref[0, 0] + jnp.float32(1.0)


@partial(jax.jit, donate_argnums=(0,))
def _add_one(p_2d):
    # p_2d: (1, 1) float32 parameter; returns p_2d + 1, written in place.
    return pl.pallas_call(
        _add_one_kernel,
        out_shape=jax.ShapeDtypeStruct((1, 1), jnp.float32),
        in_specs=[pl.BlockSpec(memory_space=pltpu.MemorySpace.SMEM)],
        out_specs=pl.BlockSpec(memory_space=pltpu.MemorySpace.SMEM),
        input_output_aliases={0: 0},
    )(p_2d)


class TestModuleJax:
    """JAX/Pallas port of TestModule.

    forward(x) ignores x (the torch forward never reads it), returns the
    updated parameter value (p + 1), and keeps the new value as its stored
    parameter, mirroring `p[0] = nn.Parameter(p[0] + 1)`.
    """

    def __init__(self):
        # torch: ParameterList([Parameter(torch.tensor(1.0))]); stored as
        # (1, 1) so the hot path needs no reshapes.
        self.p = jnp.full((1, 1), 1.0, dtype=jnp.float32)

    def forward(self, x):
        # NOTE: torch's `print(p[0])` side effect is intentionally dropped —
        # it forces a device->host sync every call.
        new_p = _add_one(self.p)
        self.p = new_p  # stateful parameter update (functional equivalent)
        # TODO(synk): the custom backward (identity grad w.r.t. `input`,
        # no grad for p) is not modeled; wrap in jax.custom_vjp if grads
        # are ever required.
        return new_p[0, 0]


if __name__ == "__main__":
    key = jax.random.PRNGKey(0)
    # The torch script uses `input = torch.tensor(1.0)`; its value is unused
    # by the forward math, but construct a deterministic input anyway.
    x = jax.random.normal(key, ()).astype(jnp.float32)

    mod = TestModuleJax()

    out1 = jax.block_until_ready(mod.forward(x))
    assert jnp.allclose(out1, jnp.float32(2.0)), out1           # 1 + 1
    assert jnp.allclose(mod.p[0, 0], jnp.float32(2.0))

    out2 = jax.block_until_ready(mod.forward(x))                # cached jit
    assert jnp.allclose(out2, jnp.float32(3.0)), out2           # 2 + 1
    assert jnp.allclose(mod.p[0, 0], jnp.float32(3.0))

    print("KERNEL_OK")
</pallas_src>

<mosaic_0001>
module attributes {stable_mosaic.version = 11 : i64} {
  func.func @_add_one_kernel(%arg0: memref<1x1xf32, #tpu.memory_space<smem>>, %arg1: memref<1x1xf32, #tpu.memory_space<smem>>) attributes {dimension_semantics = [], scalar_prefetch = 0 : i64, scratch_operands = 0 : i64, tpu.core_type = #tpu.core_type<tc>} {
    %c0 = arith.constant 0 : index
    %c0_0 = arith.constant 0 : index
    %0 = memref.load %arg0[%c0, %c0_0] : memref<1x1xf32, #tpu.memory_space<smem>>
    %cst = arith.constant 1.000000e+00 : f32
    %1 = arith.addf %0, %cst : f32
    %c0_1 = arith.constant 0 : index
    %c0_2 = arith.constant 0 : index
    %2 = memref.load %arg1[%c0_1, %c0_2] : memref<1x1xf32, #tpu.memory_space<smem>>
    memref.store %1, %arg1[%c0_1, %c0_2] : memref<1x1xf32, #tpu.memory_space<smem>>
    return
  }
}

</mosaic_0001>

<bundles_post_ra>
// kernel: _add_one.1
= control target key start
LH: loop header
LB: loop body
LE: loop exit
PB: predicated region body
PF: predicated region fallthrough
CT: control target
= control target key end

     0   :  { %7 = vsyncpa [#allocation4], 0  ;;  %s66_s0 = inlined_call_operand.<no memory space> [shape: f32[1,1], index: 0, kind: input, shape index: {}, may-alias: {0,1}]   ;;  %s67_s1 = inlined_call_operand.hbm [shape: f32[1,1], index: 1, kind: output, shape index: {}, may-alias: {0,1}]  }
   0x1   :  { %s11_s8 = sadd.f32 1.0, %s66_s0  ;;  %s28_s11 = scalar_lea.hbm %s67_s1, 16 }
   0x2   :  { %p29_p0 = scmp.ne.s32.totalorder %s67_s1, %s28_s11  ;;  %p32_p1 = scmp.lt.u32.totalorder %s28_s11, %s67_s1 }
   0x3   :  { %13 = sst [smem:[#allocation3]] %s11_s8 }
   0x4   :  { %p34_p2 = pnand %p32_p1, %p29_p0 }
   0x6   :  { %37 = shalt.err (!%p34_p2)
}
   0x7   :  { %s40_s16 = smov [#allocation3]  }
   0x8   :  { %21 = dma.smem_to_hbm %s40_s16, 16, %s67_s1, [#allocation4]  }
   0x9   :  { %38 = dma.done.wait [#allocation4], 16  }
   0xa   :  { %39 = vsyncadd [#allocation4], 4294967280 }
   0xb   :  { %25 = sfence }
   0xc   :  { %26 = vsyncpa [#allocation4], 1 }

</bundles_post_ra>
